<compile_context>
chip_gen: v5e
topology: v5e:2x2
jax: 0.10.0
libtpu: 0.0.40
codegen_flags: <defaults>
</compile_context>

<pallas_src>
import functools

import jax
import jax.numpy as jnp
from jax.experimental import pallas as pl
from jax.experimental.pallas import tpu as pltpu

H_PAD = 128  # lane-dense padded hidden width


def _round_up(n, m):
    return ((n + m - 1) // m) * m


def _mlp_kernel(x_ref,
                w1_ref, c1_ref,
                w2_ref, c2_ref,
                w3_ref, c3_ref,
                w4_ref, c4_ref,
                o_ref):
    """Fused (Linear+BN folded) -> ReLU x3 -> Linear(1) head for one batch tile."""
    h = x_ref[...]

    # Hidden layers: h = max(h @ W' + c', 0).  bf16 MXU operands, f32
    # accumulation, f32 elementwise (bias add + ReLU) so the VPU path is f32
    # on v5e as well.
    h = jnp.maximum(
        jnp.dot(h.astype(w1_ref.dtype), w1_ref[...],
                preferred_element_type=jnp.float32) + c1_ref[...], 0.0)
    h = jnp.maximum(
        jnp.dot(h.astype(w2_ref.dtype), w2_ref[...],
                preferred_element_type=jnp.float32) + c2_ref[...], 0.0)
    h = jnp.maximum(
        jnp.dot(h.astype(w3_ref.dtype), w3_ref[...],
                preferred_element_type=jnp.float32) + c3_ref[...], 0.0)

    # Output head (out dim 1): bf16-round the activations (matching the MXU
    # numerics of the reference), then VPU multiply against the (1, 128) weight
    # row and XLU lane-reduce.  Writes the true (tb, 1) column -> minimal HBM
    # writeback, no padded slab, no N=1 MXU pass.
    hb = h.astype(w4_ref.dtype).astype(jnp.float32)
    w4 = w4_ref[...].astype(jnp.float32)            # (1, 128) row, zero padded
    o_ref[...] = jnp.sum(hb * w4, axis=-1, keepdims=True) + c4_ref[...]


@functools.partial(jax.jit, static_argnames=("block_b",))
def yield_mlp_forward(x, kernel_params, block_b=1024):
    """x: (B, D_in) float32.  kernel_params: padded/folded operands.  Returns (B, 1)."""
    B, d_in = x.shape

    # bf16 input: halves x DMA; numerically identical to casting at the MXU.
    x = x.astype(jnp.bfloat16)

    # Batch tile: multiple of 8 sublanes, capped at block_b.  Working set per
    # step (weights + tile + double buffers) is well under 1 MiB, so this fits
    # comfortably inside the scoped VMEM limit on v5e/v6e/v7x.
    tb = min(block_b, _round_up(B, 8))
    b_pad = _round_up(B, tb)
    if b_pad != B:
        x = jnp.pad(x, ((0, b_pad - B), (0, 0)))
    grid = (b_pad // tb,)

    operands = [x]
    in_specs = [pl.BlockSpec((tb, d_in), lambda i: (i, 0))]
    for li in (1, 2, 3, 4):
        w = kernel_params[f"w{li}"]
        c = kernel_params[f"c{li}"]
        operands += [w, c]
        # Constant index_map -> weights/biases stay resident in VMEM across steps.
        in_specs += [pl.BlockSpec(w.shape, lambda i: (0, 0)),
                     pl.BlockSpec(c.shape, lambda i: (0, 0))]

    out = pl.pallas_call(
        _mlp_kernel,
        out_shape=jax.ShapeDtypeStruct((b_pad, 1), jnp.float32),
        grid=grid,
        in_specs=in_specs,
        out_specs=pl.BlockSpec((tb, 1), lambda i: (i, 0)),
        compiler_params=pltpu.CompilerParams(
            dimension_semantics=("parallel",),
            vmem_limit_bytes=32 * 1024 * 1024,
        ),
    )(*operands)
    return out[:B]


def init_params(key, input_dim, hidden_dims=(128, 64, 32), eps=1e-5):
    """Synthetic parameters mirroring the PyTorch module shapes (eval mode).

    Returns (folded, kernel_params):
      folded:        un-padded f32 per-layer (in,out) weight and (1,out) bias with
                     BatchNorm1d running-stat affine folded in (used by reference).
      kernel_params: zero-padded lane-dense versions; hidden weights bf16
                     (in_pad, 128); head weight stored as a bf16 (1, 128) row;
                     folded biases kept f32.
    """
    dims = list(hidden_dims)
    keys = jax.random.split(key, 6 * len(dims) + 2)
    ki = 0
    folded = {}
    prev = input_dim
    for li, h in enumerate(dims, start=1):
        w = jax.random.normal(keys[ki], (prev, h), jnp.float32) / jnp.sqrt(prev); ki += 1
        b = 0.01 * jax.random.normal(keys[ki], (1, h), jnp.float32); ki += 1
        gamma = 1.0 + 0.1 * jax.random.normal(keys[ki], (1, h), jnp.float32); ki += 1
        beta = 0.01 * jax.random.normal(keys[ki], (1, h), jnp.float32); ki += 1
        run_mean = 0.05 * jax.random.normal(keys[ki], (1, h), jnp.float32); ki += 1
        run_var = 1.0 + 0.1 * jnp.abs(jax.random.normal(keys[ki], (1, h), jnp.float32)); ki += 1
        scale = gamma / jnp.sqrt(run_var + eps)           # BN fold (eval mode)
        shift = beta - run_mean * scale
        folded[f"w{li}"] = w * scale                      # column-scaled weight
        folded[f"c{li}"] = b * scale + shift              # folded bias
        prev = h
    head = len(dims) + 1
    folded[f"w{head}"] = jax.random.normal(keys[ki], (prev, 1), jnp.float32) / jnp.sqrt(prev); ki += 1
    folded[f"c{head}"] = 0.01 * jax.random.normal(keys[ki], (1, 1), jnp.float32); ki += 1

    kernel_params = {}
    # Hidden layers: zero-pad in/out dims to 128 lanes, bf16 weights, f32 biases.
    for li in range(1, head):
        w = folded[f"w{li}"]
        c = folded[f"c{li}"]
        in_pad = input_dim if li == 1 else _round_up(w.shape[0], H_PAD)
        out_pad = _round_up(w.shape[1], H_PAD)
        w_p = jnp.zeros((in_pad, out_pad), jnp.float32).at[:w.shape[0], :w.shape[1]].set(w)
        c_p = jnp.zeros((1, out_pad), jnp.float32).at[:, :c.shape[1]].set(c)
        kernel_params[f"w{li}"] = w_p.astype(jnp.bfloat16)
        kernel_params[f"c{li}"] = c_p
    # Head: (prev, 1) weight stored as a lane-padded (1, 128) row so the kernel
    # uses a VPU multiply + lane reduction instead of an N=1 MXU matmul.
    w4 = folded[f"w{head}"]
    in_pad = _round_up(w4.shape[0], H_PAD)
    w4_row = jnp.zeros((1, in_pad), jnp.float32).at[0, :w4.shape[0]].set(w4[:, 0])
    kernel_params[f"w{head}"] = w4_row.astype(jnp.bfloat16)
    kernel_params[f"c{head}"] = folded[f"c{head}"]
    return folded, kernel_params


def reference_forward(x, folded, n_hidden=3):
    """Plain-JAX reference with the same bf16-MXU / f32-accumulate numerics."""
    h = x
    for li in range(1, n_hidden + 1):
        w = folded[f"w{li}"].astype(jnp.bfloat16)
        h = jnp.dot(h.astype(jnp.bfloat16), w, preferred_element_type=jnp.float32)
        h = jnp.maximum(h + folded[f"c{li}"], 0.0)
    w = folded[f"w{n_hidden + 1}"].astype(jnp.bfloat16)
    return (jnp.dot(h.astype(jnp.bfloat16), w, preferred_element_type=jnp.float32)
            + folded[f"c{n_hidden + 1}"])


if __name__ == "__main__":
    key = jax.random.PRNGKey(0)
    kx, kp = jax.random.split(key)

    B, D_IN = 16, 32
    x = jax.random.normal(kx, (B, D_IN), jnp.float32)
    folded, kernel_params = init_params(kp, D_IN, hidden_dims=(128, 64, 32))

    out = yield_mlp_forward(x, kernel_params)
    out = jax.block_until_ready(out)

    ref = reference_forward(x, folded)
    assert out.shape == (B, 1), out.shape
    max_err = float(jnp.max(jnp.abs(out - ref)))
    assert jnp.allclose(out, ref, atol=2e-3, rtol=2e-3), max_err

    print("KERNEL_OK")
</pallas_src>

<mosaic_0001>
module attributes {stable_mosaic.version = 11 : i64} {
  func.func @_mlp_kernel(%arg0: i32, %arg1: memref<16x32xbf16, #tpu.memory_space<vmem>>, %arg2: memref<32x128xbf16, #tpu.memory_space<vmem>>, %arg3: memref<1x128xf32, #tpu.memory_space<vmem>>, %arg4: memref<128x128xbf16, #tpu.memory_space<vmem>>, %arg5: memref<1x128xf32, #tpu.memory_space<vmem>>, %arg6: memref<128x128xbf16, #tpu.memory_space<vmem>>, %arg7: memref<1x128xf32, #tpu.memory_space<vmem>>, %arg8: memref<1x128xbf16, #tpu.memory_space<vmem>>, %arg9: memref<1x1xf32, #tpu.memory_space<vmem>>, %arg10: memref<16x1xf32, #tpu.memory_space<vmem>>) attributes {dimension_semantics = [#tpu.dimension_semantics<parallel>], iteration_bounds = array<i64: 1>, scalar_prefetch = 0 : i64, scratch_operands = 0 : i64, tpu.core_type = #tpu.core_type<tc>, window_params = [{transform_indices = @transform_0, window_bounds = array<i64: 16, 32>}, {pipeline_mode = #tpu.pipeline_mode<synchronous>, transform_indices = @transform_1, window_bounds = array<i64: 32, 128>}, {pipeline_mode = #tpu.pipeline_mode<synchronous>, transform_indices = @transform_2, window_bounds = array<i64: 1, 128>}, {pipeline_mode = #tpu.pipeline_mode<synchronous>, transform_indices = @transform_3, window_bounds = array<i64: 128, 128>}, {pipeline_mode = #tpu.pipeline_mode<synchronous>, transform_indices = @transform_4, window_bounds = array<i64: 1, 128>}, {pipeline_mode = #tpu.pipeline_mode<synchronous>, transform_indices = @transform_5, window_bounds = array<i64: 128, 128>}, {pipeline_mode = #tpu.pipeline_mode<synchronous>, transform_indices = @transform_6, window_bounds = array<i64: 1, 128>}, {pipeline_mode = #tpu.pipeline_mode<synchronous>, transform_indices = @transform_7, window_bounds = array<i64: 1, 128>}, {pipeline_mode = #tpu.pipeline_mode<synchronous>, transform_indices = @transform_8, window_bounds = array<i64: 1, 1>}, {transform_indices = @transform_9, window_bounds = array<i64: 16, 1>}]} {
    %c0 = arith.constant 0 : index
    %c0_0 = arith.constant 0 : index
    %0 = vector.load %arg1[%c0, %c0_0] : memref<16x32xbf16, #tpu.memory_space<vmem>>, vector<16x32xbf16>
    %c0_1 = arith.constant 0 : index
    %c0_2 = arith.constant 0 : index
    %1 = vector.load %arg2[%c0_1, %c0_2] : memref<32x128xbf16, #tpu.memory_space<vmem>>, vector<32x128xbf16>
    %cst = arith.constant dense<0.000000e+00> : vector<16x128xf32>
    %2 = tpu.matmul %0, %1, %cst {dimension_numbers = #tpu.dot_dimension_numbers<[1], [0], [0], [1], [0, 0, 1, 1], [], []>} : vector<16x32xbf16>, vector<32x128xbf16>, vector<16x128xf32> -> vector<16x128xf32>
    %c0_3 = arith.constant 0 : index
    %c0_4 = arith.constant 0 : index
    %3 = vector.load %arg3[%c0_3, %c0_4] : memref<1x128xf32, #tpu.memory_space<vmem>>, vector<1x128xf32>
    %4 = vector.broadcast %3 : vector<1x128xf32> to vector<16x128xf32>
    %5 = arith.addf %2, %4 : vector<16x128xf32>
    %cst_5 = arith.constant 0.000000e+00 : f32
    %6 = vector.broadcast %cst_5 : f32 to vector<16x128xf32>
    %7 = arith.maximumf %5, %6 : vector<16x128xf32>
    %8 = arith.truncf %7 : vector<16x128xf32> to vector<16x128xbf16>
    %c0_6 = arith.constant 0 : index
    %c0_7 = arith.constant 0 : index
    %9 = vector.load %arg4[%c0_6, %c0_7] : memref<128x128xbf16, #tpu.memory_space<vmem>>, vector<128x128xbf16>
    %cst_8 = arith.constant dense<0.000000e+00> : vector<16x128xf32>
    %10 = tpu.matmul %8, %9, %cst_8 {dimension_numbers = #tpu.dot_dimension_numbers<[1], [0], [0], [1], [0, 0, 1, 1], [], []>} : vector<16x128xbf16>, vector<128x128xbf16>, vector<16x128xf32> -> vector<16x128xf32>
    %c0_9 = arith.constant 0 : index
    %c0_10 = arith.constant 0 : index
    %11 = vector.load %arg5[%c0_9, %c0_10] : memref<1x128xf32, #tpu.memory_space<vmem>>, vector<1x128xf32>
    %12 = vector.broadcast %11 : vector<1x128xf32> to vector<16x128xf32>
    %13 = arith.addf %10, %12 : vector<16x128xf32>
    %cst_11 = arith.constant 0.000000e+00 : f32
    %14 = vector.broadcast %cst_11 : f32 to vector<16x128xf32>
    %15 = arith.maximumf %13, %14 : vector<16x128xf32>
    %16 = arith.truncf %15 : vector<16x128xf32> to vector<16x128xbf16>
    %c0_12 = arith.constant 0 : index
    %c0_13 = arith.constant 0 : index
    %17 = vector.load %arg6[%c0_12, %c0_13] : memref<128x128xbf16, #tpu.memory_space<vmem>>, vector<128x128xbf16>
    %cst_14 = arith.constant dense<0.000000e+00> : vector<16x128xf32>
    %18 = tpu.matmul %16, %17, %cst_14 {dimension_numbers = #tpu.dot_dimension_numbers<[1], [0], [0], [1], [0, 0, 1, 1], [], []>} : vector<16x128xbf16>, vector<128x128xbf16>, vector<16x128xf32> -> vector<16x128xf32>
    %c0_15 = arith.constant 0 : index
    %c0_16 = arith.constant 0 : index
    %19 = vector.load %arg7[%c0_15, %c0_16] : memref<1x128xf32, #tpu.memory_space<vmem>>, vector<1x128xf32>
    %20 = vector.broadcast %19 : vector<1x128xf32> to vector<16x128xf32>
    %21 = arith.addf %18, %20 : vector<16x128xf32>
    %cst_17 = arith.constant 0.000000e+00 : f32
    %22 = vector.broadcast %cst_17 : f32 to vector<16x128xf32>
    %23 = arith.maximumf %21, %22 : vector<16x128xf32>
    %24 = arith.truncf %23 : vector<16x128xf32> to vector<16x128xbf16>
    %25 = arith.extf %24 : vector<16x128xbf16> to vector<16x128xf32>
    %c0_18 = arith.constant 0 : index
    %c0_19 = arith.constant 0 : index
    %26 = vector.load %arg8[%c0_18, %c0_19] : memref<1x128xbf16, #tpu.memory_space<vmem>>, vector<1x128xbf16>
    %27 = arith.extf %26 : vector<1x128xbf16> to vector<1x128xf32>
    %28 = vector.broadcast %27 : vector<1x128xf32> to vector<16x128xf32>
    %29 = arith.mulf %25, %28 : vector<16x128xf32>
    %cst_20 = arith.constant dense<0.000000e+00> : vector<16xf32>
    %30 = vector.multi_reduction <add>, %29, %cst_20 [1] : vector<16x128xf32> to vector<16xf32>
    %31 = vector.shape_cast %30 : vector<16xf32> to vector<16x1xf32>
    %c0_21 = arith.constant 0 : index
    %c0_22 = arith.constant 0 : index
    %32 = vector.load %arg9[%c0_21, %c0_22] : memref<1x1xf32, #tpu.memory_space<vmem>>, vector<1x1xf32>
    %33 = vector.broadcast %32 : vector<1x1xf32> to vector<16x1xf32>
    %34 = arith.addf %31, %33 : vector<16x1xf32>
    %c0_23 = arith.constant 0 : index
    %c0_24 = arith.constant 0 : index
    %35 = vector.load %arg10[%c0_23, %c0_24] : memref<16x1xf32, #tpu.memory_space<vmem>>, vector<16x1xf32>
    tpu.vector_store %arg10[%c0_23, %c0_24], %34 {strides = array<i32>} : memref<16x1xf32, #tpu.memory_space<vmem>>, vector<16x1xf32>,
    return
  }
  func.func @transform_0(%arg0: i32) -> (i32, i32) {
    %c0_i32 = arith.constant 0 : i32
    %c0_i32_0 = arith.constant 0 : i32
    return %arg0, %c0_i32 : i32, i32
  }
  func.func @transform_1(%arg0: i32) -> (i32, i32) {
    %c0_i32 = arith.constant 0 : i32
    %c0_i32_0 = arith.constant 0 : i32
    %c0_i32_1 = arith.constant 0 : i32
    return %c0_i32, %c0_i32_0 : i32, i32
  }
  func.func @transform_2(%arg0: i32) -> (i32, i32) {
    %c0_i32 = arith.constant 0 : i32
    %c0_i32_0 = arith.constant 0 : i32
    %c0_i32_1 = arith.constant 0 : i32
    return %c0_i32, %c0_i32_0 : i32, i32
  }
  func.func @transform_3(%arg0: i32) -> (i32, i32) {
    %c0_i32 = arith.constant 0 : i32
    %c0_i32_0 = arith.constant 0 : i32
    %c0_i32_1 = arith.constant 0 : i32
    return %c0_i32, %c0_i32_0 : i32, i32
  }
  func.func @transform_4(%arg0: i32) -> (i32, i32) {
    %c0_i32 = arith.constant 0 : i32
    %c0_i32_0 = arith.constant 0 : i32
    %c0_i32_1 = arith.constant 0 : i32
    return %c0_i32, %c0_i32_0 : i32, i32
  }
  func.func @transform_5(%arg0: i32) -> (i32, i32) {
    %c0_i32 = arith.constant 0 : i32
    %c0_i32_0 = arith.constant 0 : i32
    %c0_i32_1 = arith.constant 0 : i32
    return %c0_i32, %c0_i32_0 : i32, i32
  }
  func.func @transform_6(%arg0: i32) -> (i32, i32) {
    %c0_i32 = arith.constant 0 : i32
    %c0_i32_0 = arith.constant 0 : i32
    %c0_i32_1 = arith.constant 0 : i32
    return %c0_i32, %c0_i32_0 : i32, i32
  }
  func.func @transform_7(%arg0: i32) -> (i32, i32) {
    %c0_i32 = arith.constant 0 : i32
    %c0_i32_0 = arith.constant 0 : i32
    %c0_i32_1 = arith.constant 0 : i32
    return %c0_i32, %c0_i32_0 : i32, i32
  }
  func.func @transform_8(%arg0: i32) -> (i32, i32) {
    %c0_i32 = arith.constant 0 : i32
    %c0_i32_0 = arith.constant 0 : i32
    %c0_i32_1 = arith.constant 0 : i32
    return %c0_i32, %c0_i32_0 : i32, i32
  }
  func.func @transform_9(%arg0: i32) -> (i32, i32) {
    %c0_i32 = arith.constant 0 : i32
    %c0_i32_0 = arith.constant 0 : i32
    return %arg0, %c0_i32 : i32, i32
  }
}

</mosaic_0001>

<bundles_post_ra>
// kernel: yield_mlp_forward.1
= control target key start
LH: loop header
LB: loop body
LE: loop exit
PB: predicated region body
PF: predicated region fallthrough
CT: control target
= control target key end

     0   :  { %s558_s0 = inlined_call_operand.vmem [shape: bf16[16,32], index: 0, kind: input, shape index: {}]   ;;  %s559_s1 = inlined_call_operand.vmem [shape: bf16[32,128], index: 1, kind: input, shape index: {}]   ;;  %s560_s2 = inlined_call_operand.vmem [shape: f32[1,128], index: 2, kind: input, shape index: {}]   ;;  %s561_s3 = inlined_call_operand.hbm [shape: bf16[128,128], index: 3, kind: input, shape index: {}]   ;;  %s562_s4 = inlined_call_operand.vmem [shape: f32[1,128], index: 4, kind: input, shape index: {}]   ;;  %s563_s5 = inlined_call_operand.hbm [shape: bf16[128,128], index: 5, kind: input, shape index: {}]   ;;  %s564_s6 = inlined_call_operand.vmem [shape: f32[1,128], index: 6, kind: input, shape index: {}]   ;;  %s565_s7 = inlined_call_operand.vmem [shape: bf16[1,128], index: 7, kind: input, shape index: {}]   ;;  %s566_s8 = inlined_call_operand.<no memory space> [shape: f32[1,1], index: 8, kind: input, shape index: {}]   ;;  %s567_s9 = inlined_call_operand.vmem [shape: f32[16,1], index: 9, kind: output, shape index: {}]  }
   0x1   :  { %v14_v0 = vstv %s566_s8 }
   0x2   :  { %15 = vst [vmem:[#allocation2] sm:$0x1] %v14_v0 }
   0x3   :  { %16 = vsyncpa [#allocation4], 0  ;;  %s28_s13 = sshll.u32 %s561_s3, 4  ;;  %s29_s13 = int_to_ptr.hbm [resolvable:$true] %s28_s13 }
   0x4   :  { %17 = vsyncpa [#allocation6], 0  ;;  %s468_s14 = smov [#allocation3]   ;;  %s43_s18 = sshll.u32 %s563_s5, 4  ;;  %s44_s18 = int_to_ptr.hbm [resolvable:$true] %s43_s18 }
   0x5   :  { %s30_s15 = sshll.u32 %s468_s14, 4  ;;  %s469_s19 = smov 64   ;;  %s31_s15 = int_to_ptr.vmem [resolvable:$true] %s30_s15 }
   0x6   :  { %s470_s20 = smov 4   ;;  %s471_s8 = smov [#allocation5]  }
   0x7   :  { %36 = dma.hbm_to_vmem [thread:$0]  %s29_s13, 1024, %s31_s15, [#allocation4], %s469_s19, %s469_s19, %s470_s20  }
   0x8   :  { %s45_s21 = sshll.u32 %s471_s8, 4  ;;  %s46_s21 = int_to_ptr.vmem [resolvable:$true] %s45_s21 }
   0x9   :  { %51 = dma.hbm_to_vmem [thread:$0]  %s44_s18, 1024, %s46_s21, [#allocation6], %s469_s19, %s469_s19, %s470_s20  }
   0xa   :  { %464 = dma.done.wait [#allocation4], 1024  }
   0xb   :  { %465 = vsyncadd [#allocation4], 4294966272 }
   0xc   :  { %466 = dma.done.wait [#allocation6], 1024  }
   0xd   :  { %467 = vsyncadd [#allocation6], 4294966272  ;;  %v391_v1 = vld [vmem:[%s559_s1 + $0x8] sm:$0xff]  ;;  %v399_v2 = vld [vmem:[#allocation3 + $0x38] sm:$0xff]  ;;  %vm94_vm0 = vcmask 261120   ;;  %vm303_vm1 = vcmask 7168  }
   0xe   :  { %104 = vmatpush.bf16.msra.mxu0 %v391_v1  ;;  %v390_v3 = vld [vmem:[%s559_s1] sm:$0xff]  ;;  %v398_v4 = vld [vmem:[#allocation3 + $0x30] sm:$0xff]  ;;  %183 = vmatpush.bf16.msra.mxu1 %v399_v2  ;;  %v397_v6 = vld [vmem:[#allocation3 + $0x28] sm:$0xff] }
   0xf   :  { %v389_v5 = vld [vmem:[%s558_s0] sm:$0xff]  ;;  %v394_v9 = vld [vmem:[#allocation3 + $0x10] sm:$0xff]  ;;  %v393_v10 = vld [vmem:[#allocation3 + $0x8] sm:$0xff] }
  0x10   :  { %v396_v7 = vld [vmem:[#allocation3 + $0x20] sm:$0xff]  ;;  %v395_v8 = vld [vmem:[#allocation3 + $0x18] sm:$0xff]  ;;  %v406_v13 = vld [vmem:[#allocation5 + $0x30] sm:$0xff] }
  0x11   :  { %v392_v11 = vld [vmem:[#allocation3] sm:$0xff]  ;;  %v407_v12 = vld [vmem:[#allocation5 + $0x38] sm:$0xff]  ;;  %v405_v14 = vld [vmem:[#allocation5 + $0x28] sm:$0xff] }
  0x12   :  { %105 = vmatpush.bf16.msra.mxu0 %v390_v3  ;;  %184 = vmatpush.bf16.msra.mxu1 %v398_v4  ;;  %v404_v15 = vld [vmem:[#allocation5 + $0x20] sm:$0xff]  ;;  %v412_v17 = vld [vmem:[%s560_s2] ss:$0 sm:$0xff]  ;;  %v402_v25 = vld [vmem:[#allocation5 + $0x10] sm:$0xff] }
  0x13   :  { %268 = vmatpush.bf16.msra.mxu2 %v407_v12  ;;  %v403_v24 = vld [vmem:[#allocation5 + $0x18] sm:$0xff]  ;;  %v401_v26 = vld [vmem:[#allocation5 + $0x8] sm:$0xff]  ;;  %v400_v27 = vld [vmem:[#allocation5] sm:$0xff] }
  0x14   :  { %v413_v29 = vld [vmem:[%s562_s4] ss:$0 sm:$0xff] }
  0x15   :  { %324 = vmatmul.msk.bf16.vlgmr.msra.gmra.mxu0 %vm94_vm0, %v389_v5  ;;  %v414_v36 = vld [vmem:[%s564_s6] ss:$0 sm:$0xff] }
  0x16   :  { %185 = vmatpush.bf16.msra.mxu1 %v397_v6  ;;  %v288_v37 = vld [vmem:[%s565_s7] sm:$0x1] }
  0x17   :  { %269 = vmatpush.bf16.msra.mxu2 %v406_v13  ;;  %v289_v40 = vunpack.c.l.bf16 %v288_v37  ;;  %v415_v52 = vld [vmem:[#allocation2] ss:$0 sm:$0xff] }
  0x19   :  { %v290_v43 = vperm.slane %v289_v40, 0 }
  0x1a   :  { %186 = vmatpush.bf16.msra.mxu1 %v396_v7 }
  0x1b   :  { %270 = vmatpush.bf16.msra.mxu2 %v405_v14 }
  0x1e   :  { %187 = vmatpush.bf16.msra.mxu1 %v395_v8 }
  0x1f   :  { %271 = vmatpush.bf16.msra.mxu2 %v404_v15 }
  0x22   :  { %188 = vmatpush.bf16.msra.mxu1 %v394_v9 }
  0x23   :  { %272 = vmatpush.bf16.msra.mxu2 %v403_v24 }
  0x26   :  { %189 = vmatpush.bf16.msra.mxu1 %v393_v10 }
  0x27   :  { %273 = vmatpush.bf16.msra.mxu2 %v402_v25 }
  0x2a   :  { %190 = vmatpush.bf16.msra.mxu1 %v392_v11 }
  0x2b   :  { %274 = vmatpush.bf16.msra.mxu2 %v401_v26 }
  0x2f   :  { %275 = vmatpush.bf16.msra.mxu2 %v400_v27 }
  0x92   :  { %v107_v16 = vpop.f32.mrf.mxu0 }
  0x93   :  { %v108_v18 = vadd.f32 %v412_v17, %v107_v16 }
  0x95   :  { %v112_v21 = vmax.f32 %v108_v18, 0.0 }
  0x9a   :  { %v109_v19 = vpop.f32.mrf.mxu0 }
  0x9b   :  { %v110_v20 = vadd.f32 %v412_v17, %v109_v19 }
  0x9d   :  { %v113_v22 = vmax.f32 %v110_v20, 0.0 }
  0x9f   :  { %v114_v23 = vpack.c.bf16 %v113_v22, %v112_v21 }
  0xa1   :  { %191 = vmatmul.bf16.vlgmr.msra.gmra.mxu1 %v114_v23 }
 0x11e   :  { %v192_v28 = vpop.f32.mrf.mxu1 }
 0x11f   :  { %v193_v30 = vadd.f32 %v413_v29, %v192_v28 }
 0x121   :  { %v197_v33 = vmax.f32 %v193_v30, 0.0 }
 0x126   :  { %v194_v31 = vpop.f32.mrf.mxu1 }
 0x127   :  { %v195_v32 = vadd.f32 %v413_v29, %v194_v31 }
 0x129   :  { %v198_v34 = vmax.f32 %v195_v32, 0.0 }
 0x12b   :  { %v199_v35 = vpack.c.bf16 %v198_v34, %v197_v33 }
 0x12d   :  { %276 = vmatmul.bf16.vlgmr.msra.gmra.mxu2 %v199_v35 }
 0x1b0   :  { %v277_v38 = vpop.f32.mrf.mxu2 }
 0x1b1   :  { %v278_v39 = vadd.f32 %v414_v36, %v277_v38 }
 0x1b3   :  { %v282_v41 = vmax.f32 %v278_v39, 0.0 }
 0x1b5   :  { %v284_v42 = vpack.c.bf16 %v282_v41, %v282_v41 }
 0x1b7   :  { %v286_v44 = vunpack.c.l.bf16 %v284_v42 }
 0x1b8   :  { %v279_v45 = vpop.f32.mrf.mxu2 }
 0x1b9   :  { %v280_v46 = vadd.f32 %v414_v36, %v279_v45  ;;  %v291_v47 = vmul.f32 %v290_v43, %v286_v44 }
 0x1bb   :  { %v283_v48 = vmax.f32 %v280_v46, 0.0  ;;  %293 = vadd.xlane.f32.xlu0 %v291_v47 }
 0x1bd   :  { %v285_v49 = vpack.c.bf16 %v283_v48, %v283_v48 }
 0x1bf   :  { %v287_v50 = vunpack.c.l.bf16 %v285_v49 }
 0x1c1   :  { %v292_v51 = vmul.f32 %v290_v43, %v287_v50 }
 0x1c3   :  { %295 = vadd.xlane.f32.xlu0 %v292_v51 }
 0x22e   :  { %v294_v53 = vpop.xlane.xlu0 %293 }
 0x22f   :  { %v301_v54 = vadd.f32 %v415_v52, %v294_v53 }
 0x231   :  { %304 = vst.msk [vmem:[%s567_s9] sm:$0xff] %vm303_vm1, %v301_v54 }
 0x236   :  { %v296_v55 = vpop.xlane.xlu0 %295 }
 0x237   :  { %v302_v56 = vadd.f32 %v415_v52, %v296_v55 }
 0x239   :  { %305 = vst.msk [vmem:[%s567_s9 + $0x8] sm:$0xff] %vm303_vm1, %v302_v56 }
 0x23a   :  { %310 = vsyncpa [#allocation4], 1 }
 0x23b   :  { %311 = vsyncpa [#allocation6], 1 }

</bundles_post_ra>
